<compile_context>
chip_gen: v6e
topology: v6e:2x2x1
jax: 0.10.0
libtpu: 0.0.40
codegen_flags: <defaults>
</compile_context>

<pallas_src>
import functools

import jax
import jax.numpy as jnp
from jax import lax
from jax.experimental import pallas as pl
from jax.experimental.pallas import tpu as pltpu


# ----------------------------------------------------------------------------- helpers
def _vmem_capacity_bytes():
    try:
        info = pltpu.get_tpu_info()
        cap = getattr(info, "vmem_capacity_bytes", None)
        if cap:
            return int(cap)
    except Exception:
        pass
    return 64 * 1024 * 1024  # conservative default: v7x per-TensorCore VMEM


def _sublane_multiple(dtype):
    return {4: 8, 2: 16, 1: 32}.get(jnp.dtype(dtype).itemsize, 8)


def _round_down(v, m):
    return (v // m) * m


def _round_up(v, m):
    return ((v + m - 1) // m) * m


# ----------------------------------------------------------------------------- kernels
def _single_pass_kernel(x_ref, gf_ref, o_ref, *, eps, inv_n, chunk):
    """Whole (T, D) slab for one batch element resident in VMEM; true two-sweep variance."""
    T, D = x_ref.shape
    gf = gf_ref[...]  # (D, C2) 0/1: lane -> channel group
    bounds = [(s, min(chunk, T - s)) for s in range(0, T, chunk)]

    # Sweep 1: per-lane sum (chunked, f32 accumulation) -> per-group mean -> per-lane shift.
    s = jnp.zeros((1, D), jnp.float32)
    for start, size in bounds:
        xc = x_ref[start:start + size, :].astype(jnp.float32)
        s = s + jnp.sum(xc, axis=0, keepdims=True)
    mean_c2 = jnp.dot(s, gf, preferred_element_type=jnp.float32) * inv_n          # (1, C2)
    shift = lax.dot_general(mean_c2, gf, (((1,), (1,)), ((), ())),
                            preferred_element_type=jnp.float32)                   # (1, D)

    # Sweep 2: centered sum-of-squares (numerically robust two-pass variance).
    q = jnp.zeros((1, D), jnp.float32)
    for start, size in bounds:
        xc = x_ref[start:start + size, :].astype(jnp.float32)
        d = xc - shift
        q = q + jnp.sum(d * d, axis=0, keepdims=True)
    var_c2 = jnp.maximum(jnp.dot(q, gf, preferred_element_type=jnp.float32) * inv_n, 0.0)
    scale = lax.dot_general(lax.rsqrt(var_c2 + eps), gf, (((1,), (1,)), ((), ())),
                            preferred_element_type=jnp.float32)                   # (1, D)

    # Sweep 3: normalize and store (fresh native-dtype loads; no long-lived f32 slab).
    for start, size in bounds:
        xc = x_ref[start:start + size, :].astype(jnp.float32)
        o_ref[start:start + size, :] = ((xc - shift) * scale).astype(o_ref.dtype)


def _stats_kernel(x_ref, gf_ref, stats_ref, pilot_ref, s_ref, q_ref, *, eps, inv_n, t_true):
    """grid (B, nT): accumulate pilot-shifted sum / sum-of-squares; finalize shift/scale."""
    t = pl.program_id(1)
    bR, D = x_ref.shape

    @pl.when(t == 0)
    def _():
        pilot_ref[...] = x_ref[0:1, :].astype(jnp.float32)     # per-lane pilot (first row)
        s_ref[...] = jnp.zeros_like(s_ref)
        q_ref[...] = jnp.zeros_like(q_ref)

    xf = x_ref[...].astype(jnp.float32)
    # Mask rows past the true T (cdiv tail tile reads undefined padding).
    row = lax.broadcasted_iota(jnp.int32, (bR, D), 0) + t * bR
    d = jnp.where(row < t_true, xf - pilot_ref[...], 0.0)
    s_ref[...] += jnp.sum(d, axis=0, keepdims=True)
    q_ref[...] += jnp.sum(d * d, axis=0, keepdims=True)

    @pl.when(t == pl.num_programs(1) - 1)
    def _():
        gf = gf_ref[...]
        p = pilot_ref[...]
        s = s_ref[...]
        n_rows = float(t_true)
        # sum(x) per lane = s + R * pilot; fold to per-group mean and broadcast back.
        mean_c2 = jnp.dot(s + n_rows * p, gf, preferred_element_type=jnp.float32) * inv_n
        shift = lax.dot_general(mean_c2, gf, (((1,), (1,)), ((), ())),
                                preferred_element_type=jnp.float32)               # (1, D)
        # sum((x - mean)^2) per lane = q + 2*(p - mean)*s + R*(p - mean)^2.
        dm = p - shift
        v_lane = q_ref[...] + 2.0 * dm * s + n_rows * dm * dm
        var_c2 = jnp.maximum(jnp.dot(v_lane, gf, preferred_element_type=jnp.float32) * inv_n, 0.0)
        scale = lax.dot_general(lax.rsqrt(var_c2 + eps), gf, (((1,), (1,)), ((), ())),
                                preferred_element_type=jnp.float32)               # (1, D)
        stats_ref[0:1, :] = shift
        stats_ref[1:2, :] = scale


def _normalize_kernel(x_ref, stats_ref, o_ref):
    """grid (B, nT), fully parallel: one load, sub, mul, store per tile."""
    shift = stats_ref[0:1, :]
    scale = stats_ref[1:2, :]
    o_ref[...] = ((x_ref[...].astype(jnp.float32) - shift) * scale).astype(o_ref.dtype)


# ----------------------------------------------------------------------------- wrapper
def instance_norm2d(x, eps=1e-5, *, block_rows=None):
    """x: (B, T, C1, C2) -> instance-normalized tensor (stats over (T, C1) per (B, C2))."""
    B, T, C1, C2 = x.shape
    D = C1 * C2
    itemsize = jnp.dtype(x.dtype).itemsize
    inv_n = 1.0 / float(T * C1)
    sub = _sublane_multiple(x.dtype)
    eps = float(eps)

    # Lane-dense view of the same HBM bytes (no transpose, no copy).
    x3 = x.reshape(B, T, D)
    # 0/1 group matrix: lane l belongs to channel group (l % C2).
    g_fold = (jnp.arange(D, dtype=jnp.int32)[:, None] % C2
              == jnp.arange(C2, dtype=jnp.int32)[None, :]).astype(jnp.float32)     # (D, C2)

    cap = _vmem_capacity_bytes()
    vmem_limit = int(cap * 0.85)

    # Chunk rows for the single-pass in-kernel sweeps (sublane-aligned where possible).
    chunk = min(T, 512)
    if chunk >= sub:
        chunk = _round_down(chunk, sub)
    chunk = max(chunk, 1)

    # Actual single-pass resident set: 2x in block + 2x out block + chunk f32 temps +
    # lane-padded group matrix (double-buffered) + slack.
    slab = T * D * itemsize
    gmat_bytes = 2 * D * max(C2, 128) * 4
    single_resident = 4 * slab + 2 * chunk * D * 4 + gmat_bytes + (1 << 20)
    use_single = single_resident <= int(0.75 * cap)
    if block_rows is not None:
        use_single = int(block_rows) >= T

    n_elems = B * T * D
    out_shape3 = jax.ShapeDtypeStruct((B, T, D), x.dtype)

    if use_single:
        kernel = functools.partial(_single_pass_kernel, eps=eps, inv_n=inv_n, chunk=chunk)
        out3 = pl.pallas_call(
            kernel,
            out_shape=out_shape3,
            grid=(B,),
            in_specs=[
                pl.BlockSpec((None, T, D), lambda b: (b, 0, 0)),
                pl.BlockSpec((D, C2), lambda b: (0, 0)),
            ],
            out_specs=pl.BlockSpec((None, T, D), lambda b: (b, 0, 0)),
            compiler_params=pltpu.CompilerParams(
                dimension_semantics=("parallel",),
                vmem_limit_bytes=vmem_limit),
            cost_estimate=pl.CostEstimate(
                flops=7 * n_elems, transcendentals=B * C2,
                bytes_accessed=2 * n_elems * itemsize),
        )(x3, g_fold)
        return out3.reshape(B, T, C1, C2)

    # ---------------- tiled path: stats pass + streaming normalize pass -----------------
    if block_rows is None:
        budget = int(0.70 * cap) - gmat_bytes - (1 << 20)
        per_row = D * (4 * itemsize + 4)          # 2 in + 2 out blocks + f32 temp per row
        bR = _round_down(max(budget, per_row * sub) // per_row, sub)
        bR = max(sub, min(bR, 1024))              # >=512-row tiles are at the HBM roofline
    else:
        bR = max(sub, _round_down(int(block_rows), sub))
    bR = min(bR, _round_up(T, sub))
    nT = pl.cdiv(T, bR)

    stats = pl.pallas_call(
        functools.partial(_stats_kernel, eps=eps, inv_n=inv_n, t_true=T),
        out_shape=jax.ShapeDtypeStruct((B, 2, D), jnp.float32),
        grid=(B, nT),
        in_specs=[
            pl.BlockSpec((None, bR, D), lambda b, t: (b, t, 0)),
            pl.BlockSpec((D, C2), lambda b, t: (0, 0)),
        ],
        out_specs=pl.BlockSpec((None, 2, D), lambda b, t: (b, 0, 0)),
        scratch_shapes=[
            pltpu.VMEM((1, D), jnp.float32),   # pilot (first row per lane)
            pltpu.VMEM((1, D), jnp.float32),   # running sum(x - pilot)
            pltpu.VMEM((1, D), jnp.float32),   # running sum((x - pilot)^2)
        ],
        compiler_params=pltpu.CompilerParams(
            dimension_semantics=("parallel", "arbitrary"),
            vmem_limit_bytes=vmem_limit),
        cost_estimate=pl.CostEstimate(
            flops=5 * n_elems, transcendentals=B * C2,
            bytes_accessed=n_elems * itemsize),
    )(x3, g_fold)

    out3 = pl.pallas_call(
        _normalize_kernel,
        out_shape=out_shape3,
        grid=(B, nT),
        in_specs=[
            pl.BlockSpec((None, bR, D), lambda b, t: (b, t, 0)),
            pl.BlockSpec((None, 2, D), lambda b, t: (b, 0, 0)),
        ],
        out_specs=pl.BlockSpec((None, bR, D), lambda b, t: (b, t, 0)),
        compiler_params=pltpu.CompilerParams(
            dimension_semantics=("parallel", "parallel"),   # both v7x cores, even for B == 1
            vmem_limit_bytes=vmem_limit),
        cost_estimate=pl.CostEstimate(
            flops=2 * n_elems, transcendentals=0,
            bytes_accessed=2 * n_elems * itemsize),
    )(x3, stats)

    return out3.reshape(B, T, C1, C2)


# ----------------------------------------------------------------------------- reference
def _reference(x, eps=1e-5):
    xf = x.astype(jnp.float32)
    mean = jnp.mean(xf, axis=(1, 2), keepdims=True)
    var = jnp.mean((xf - mean) ** 2, axis=(1, 2), keepdims=True)
    return ((xf - mean) * lax.rsqrt(var + eps)).astype(x.dtype)


if __name__ == "__main__":
    key = jax.random.PRNGKey(0)
    k1, k2 = jax.random.split(key)

    # (batch, time, channel1, channel2): num_features = channel2; normalization is
    # over (time, channel1) per (batch, channel2).
    B, T, C1, C2 = 2, 8, 16, 16                 # D = 256 -> lane-dense single-pass path
    x1 = jax.random.normal(k1, (B, T, C1, C2), dtype=jnp.float32) * 2.0 + 3.0
    out1 = jax.block_until_ready(instance_norm2d(x1, eps=1e-5))
    ref1 = _reference(x1, eps=1e-5)
    assert out1.shape == x1.shape and out1.dtype == x1.dtype
    assert float(jnp.max(jnp.abs(out1 - ref1))) < 1e-4

    # Exercise the split stats + streaming-normalize tiled path (cdiv grid, pilot stats).
    B2, T2, C12, C22 = 2, 32, 8, 24             # D = 192, nT = 4 with block_rows=8
    x2 = jax.random.normal(k2, (B2, T2, C12, C22), dtype=jnp.float32) * 1.5 + 5.0
    out2 = jax.block_until_ready(instance_norm2d(x2, eps=1e-5, block_rows=8))
    ref2 = _reference(x2, eps=1e-5)
    assert out2.shape == x2.shape and out2.dtype == x2.dtype
    assert float(jnp.max(jnp.abs(out2 - ref2))) < 1e-4

    print("KERNEL_OK")
</pallas_src>

<mosaic_0001>
module attributes {stable_mosaic.version = 11 : i64} {
  func.func @_single_pass_kernel(%arg0: i32, %arg1: memref<1x8x256xf32, #tpu.memory_space<vmem>>, %arg2: memref<256x16xf32, #tpu.memory_space<vmem>>, %arg3: memref<1x8x256xf32, #tpu.memory_space<vmem>>) attributes {dimension_semantics = [#tpu.dimension_semantics<parallel>], iteration_bounds = array<i64: 2>, scalar_prefetch = 0 : i64, scratch_operands = 0 : i64, tpu.core_type = #tpu.core_type<tc>, window_params = [{transform_indices = @transform_0, window_bounds = array<i64: 1, 8, 256>}, {pipeline_mode = #tpu.pipeline_mode<synchronous>, transform_indices = @transform_1, window_bounds = array<i64: 256, 16>}, {transform_indices = @transform_2, window_bounds = array<i64: 1, 8, 256>}]} {
    %c0 = arith.constant 0 : index
    %c0_0 = arith.constant 0 : index
    %0 = vector.load %arg2[%c0, %c0_0] : memref<256x16xf32, #tpu.memory_space<vmem>>, vector<256x16xf32>
    %cst = arith.constant 0.000000e+00 : f32
    %1 = vector.broadcast %cst : f32 to vector<1x256xf32>
    %c0_1 = arith.constant 0 : index
    %c0_2 = arith.constant 0 : index
    %c0_3 = arith.constant 0 : index
    %2 = vector.load %arg1[%c0_1, %c0_2, %c0_3] : memref<1x8x256xf32, #tpu.memory_space<vmem>>, vector<1x8x256xf32>
    %3 = vector.shape_cast %2 : vector<1x8x256xf32> to vector<8x256xf32>
    %cst_4 = arith.constant dense<0.000000e+00> : vector<256xf32>
    %4 = vector.multi_reduction <add>, %3, %cst_4 [0] : vector<8x256xf32> to vector<256xf32>
    %5 = vector.shape_cast %4 : vector<256xf32> to vector<1x256xf32>
    %6 = arith.addf %1, %5 : vector<1x256xf32>
    %cst_5 = arith.constant dense<0.000000e+00> : vector<1x16xf32>
    %7 = tpu.matmul %6, %0, %cst_5 {dimension_numbers = #tpu.dot_dimension_numbers<[1], [0], [0], [1], [0, 0, 1, 1], [], []>} : vector<1x256xf32>, vector<256x16xf32>, vector<1x16xf32> -> vector<1x16xf32>
    %cst_6 = arith.constant 7.812500e-03 : f32
    %8 = vector.broadcast %cst_6 : f32 to vector<1x16xf32>
    %9 = arith.mulf %7, %8 : vector<1x16xf32>
    %cst_7 = arith.constant dense<0.000000e+00> : vector<1x256xf32>
    %10 = tpu.matmul %9, %0, %cst_7 {dimension_numbers = #tpu.dot_dimension_numbers<[1], [1], [0], [0], [0, 0, 1, 0], [], []>} : vector<1x16xf32>, vector<256x16xf32>, vector<1x256xf32> -> vector<1x256xf32>
    %cst_8 = arith.constant 0.000000e+00 : f32
    %11 = vector.broadcast %cst_8 : f32 to vector<1x256xf32>
    %c0_9 = arith.constant 0 : index
    %c0_10 = arith.constant 0 : index
    %c0_11 = arith.constant 0 : index
    %12 = vector.load %arg1[%c0_9, %c0_10, %c0_11] : memref<1x8x256xf32, #tpu.memory_space<vmem>>, vector<1x8x256xf32>
    %13 = vector.shape_cast %12 : vector<1x8x256xf32> to vector<8x256xf32>
    %14 = vector.broadcast %10 : vector<1x256xf32> to vector<8x256xf32>
    %15 = arith.subf %13, %14 : vector<8x256xf32>
    %16 = arith.mulf %15, %15 : vector<8x256xf32>
    %cst_12 = arith.constant dense<0.000000e+00> : vector<256xf32>
    %17 = vector.multi_reduction <add>, %16, %cst_12 [0] : vector<8x256xf32> to vector<256xf32>
    %18 = vector.shape_cast %17 : vector<256xf32> to vector<1x256xf32>
    %19 = arith.addf %11, %18 : vector<1x256xf32>
    %cst_13 = arith.constant dense<0.000000e+00> : vector<1x16xf32>
    %20 = tpu.matmul %19, %0, %cst_13 {dimension_numbers = #tpu.dot_dimension_numbers<[1], [0], [0], [1], [0, 0, 1, 1], [], []>} : vector<1x256xf32>, vector<256x16xf32>, vector<1x16xf32> -> vector<1x16xf32>
    %cst_14 = arith.constant 7.812500e-03 : f32
    %21 = vector.broadcast %cst_14 : f32 to vector<1x16xf32>
    %22 = arith.mulf %20, %21 : vector<1x16xf32>
    %cst_15 = arith.constant 0.000000e+00 : f32
    %23 = vector.broadcast %cst_15 : f32 to vector<1x16xf32>
    %24 = arith.maximumf %22, %23 : vector<1x16xf32>
    %cst_16 = arith.constant 9.99999974E-6 : f32
    %25 = vector.broadcast %cst_16 : f32 to vector<1x16xf32>
    %26 = arith.addf %24, %25 : vector<1x16xf32>
    %27 = math.rsqrt %26 : vector<1x16xf32>
    %cst_17 = arith.constant dense<0.000000e+00> : vector<1x256xf32>
    %28 = tpu.matmul %27, %0, %cst_17 {dimension_numbers = #tpu.dot_dimension_numbers<[1], [1], [0], [0], [0, 0, 1, 0], [], []>} : vector<1x16xf32>, vector<256x16xf32>, vector<1x256xf32> -> vector<1x256xf32>
    %c0_18 = arith.constant 0 : index
    %c0_19 = arith.constant 0 : index
    %c0_20 = arith.constant 0 : index
    %29 = vector.load %arg1[%c0_18, %c0_19, %c0_20] : memref<1x8x256xf32, #tpu.memory_space<vmem>>, vector<1x8x256xf32>
    %30 = vector.shape_cast %29 : vector<1x8x256xf32> to vector<8x256xf32>
    %31 = vector.broadcast %10 : vector<1x256xf32> to vector<8x256xf32>
    %32 = arith.subf %30, %31 : vector<8x256xf32>
    %33 = vector.broadcast %28 : vector<1x256xf32> to vector<8x256xf32>
    %34 = arith.mulf %32, %33 : vector<8x256xf32>
    %c0_21 = arith.constant 0 : index
    %c0_22 = arith.constant 0 : index
    %c0_23 = arith.constant 0 : index
    %35 = vector.load %arg3[%c0_21, %c0_22, %c0_23] : memref<1x8x256xf32, #tpu.memory_space<vmem>>, vector<1x8x256xf32>
    %36 = vector.shape_cast %35 : vector<1x8x256xf32> to vector<8x256xf32>
    %37 = vector.shape_cast %34 : vector<8x256xf32> to vector<1x8x256xf32>
    tpu.vector_store %arg3[%c0_21, %c0_22, %c0_23], %37 {strides = array<i32>} : memref<1x8x256xf32, #tpu.memory_space<vmem>>, vector<1x8x256xf32>,
    return
  }
  func.func @transform_0(%arg0: i32) -> (i32, i32, i32) {
    %c0_i32 = arith.constant 0 : i32
    %c0_i32_0 = arith.constant 0 : i32
    %c0_i32_1 = arith.constant 0 : i32
    return %arg0, %c0_i32, %c0_i32_0 : i32, i32, i32
  }
  func.func @transform_1(%arg0: i32) -> (i32, i32) {
    %c0_i32 = arith.constant 0 : i32
    %c0_i32_0 = arith.constant 0 : i32
    %c0_i32_1 = arith.constant 0 : i32
    return %c0_i32, %c0_i32_0 : i32, i32
  }
  func.func @transform_2(%arg0: i32) -> (i32, i32, i32) {
    %c0_i32 = arith.constant 0 : i32
    %c0_i32_0 = arith.constant 0 : i32
    %c0_i32_1 = arith.constant 0 : i32
    return %arg0, %c0_i32, %c0_i32_0 : i32, i32, i32
  }
}

</mosaic_0001>

<bundles_post_ra>
// kernel: tpu_custom_call.1
= control target key start
LH: loop header
LB: loop body
LE: loop exit
PB: predicated region body
PF: predicated region fallthrough
CT: control target
= control target key end

     0   :  { %7 = vsyncpa [#allocation3], 0  ;;  %s1498_s0 = inlined_call_operand.vmem [shape: f32[2,8,256], index: 0, kind: input, shape index: {}]   ;;  %s1499_s1 = inlined_call_operand.vmem [shape: f32[256,16], index: 1, kind: input, shape index: {}]   ;;  %s1500_s2 = inlined_call_operand.hbm [shape: f32[2,8,256], index: 2, kind: output, shape index: {}]  }
   0x1   :  { %9 = vsyncpa [#allocation3 + $0x1], 0  ;;  %s1029_s9 = smov 0   ;;  %s1031_s10 = smov 0  }
   0x2   :  { %s1033_s11 = smov 0   ;;  %s1035_s12 = smov 0  }
   0x3 LB: > { %s1050_s13 = sadd.s32 4294967295, %s1011_s12   ;;  %s692_s14 = sadd.s32 4294967294, %s1011_s12   ;;  %s1011_s12 = sphi %s1035_s12, %s1506_s12   ;;  %s1007_s11 = sphi %s1033_s11, %s1505_s11   ;;  %s1003_s10 = sphi %s1031_s10, %s1504_s10   ;;  %s999_s9 = sphi %s1029_s9, %s1503_s9  }
   0x4   : > { %s1054_s15 = sadd.s32 1, %s1011_s12   ;;  %s69_s16 = sadd.s32 1, %s1007_s11 }
   0x5   : > { %s66_s17 = ssub.s32 %s1011_s12, %s1054_s15  ;;  %p79_p0 = scmp.ne.s32.totalorder %s1007_s11, %s1003_s10 }
   0x6   : > { %p67_p1 = scmp.eq.s32.totalorder %s66_s17, 0  ;;  %p80_p2 = scmp.eq.s32.totalorder %s1050_s13, 1 }
   0x7   : > { %p85_p3 = scmp.ne.s32.totalorder %s1003_s10, %s999_s9  ;;  %p86_p4 = scmp.eq.s32.totalorder %s692_s14, 1 }
   0x8   : > { %s1065_s18 = scalar_select %p67_p1, %s1007_s11, %s69_s16  }
   0x9   : > { %p1067_p5 = por %p80_p2, %p79_p0  ;;  %p1071_p6 = por %p86_p4, %p85_p3 }
   0xa   : > { %p695_p7 = scmp.ge.s32.totalorder %s1011_s12, 1  ;;  %p115_p8 = scmp.lt.s32.totalorder %s1011_s12, 3 }
   0xc   : > { %p116_p9 = pnand %p695_p7, %p115_p8 }
   0xd   : > { %p137_p10 = scmp.lt.s32.totalorder (!%p116_p9), %s1050_s13, 1  ;;  %s134_s5 = sand.u32 (!%p116_p9), 1, %s1003_s10  }
   0xe   : > { %119 = sbr.rel (%p116_p9) target bundleno = 896 (0x380), region = 28  ;;  %s696_s6 = sshll.u32 (!%p116_p9), %s134_s5, 4 }
   0xf   : > { %s771_s7 = sshll.u32 (!%p116_p9), %s1050_s13, 8  ;;  %s619_s22 = scalar_lea.sflag (!%p116_p9), [#allocation3], %s134_s5 }
  0x10   : > { %s631_s21 = scalar_lea.hbm (!%p116_p9), %s1500_s2, %s771_s7 }
  0x13   : > { %v1080_v0 = vld [vmem:[%s1499_s1 + $0xf8] sm:$0xff]  ;;  %v1090_v2 = vld [vmem:[%s1499_s1 + $0xf0] sm:$0xff]  ;;  %v1104_v4 = vld [vmem:[%s1499_s1 + $0xe8] sm:$0xff]  ;;  %s138_s3 = scalar_select %p137_p10, %s1050_s13, 1  ;;  %vm261_vm0 = vcmask 130048   ;;  %v432_v50 = vlaneseq }
  0x14   : > { %v1085_v1 = vld [vmem:[%s1499_s1 + $0x78] sm:$0xff]  ;;  %772 = vmatprep.subr.mxu1 %v1080_v0  ;;  %v1097_v3 = vld [vmem:[%s1499_s1 + $0x70] sm:$0xff]  ;;  %841 = vmatprep.subr.mxu0 %v1080_v0  ;;  %v1112_v5 = vld [vmem:[%s1499_s1 + $0x68] sm:$0xff]  ;;  %s1013_s13 = smov [#allocation2]  }
  0x15   : > { %773 = vmatpush3.msra.mxu1 %v1085_v1  ;;  %842 = vmatpush3.msra.mxu0 %v1085_v1  ;;  %v1119_v6 = vld [vmem:[%s1499_s1 + $0xe0] sm:$0xff]  ;;  %s770_s8 = sshll.u32 %s138_s3, 4  ;;  %v1133_v8 = vld [vmem:[%s1499_s1 + $0xd8] sm:$0xff]  ;;  %v1150_v10 = vld [vmem:[%s1499_s1 + $0xd0] sm:$0xff]  ;;  %v433_v51 = vshrl.u32 %v432_v50, 7  ;;  %s955_s24 = sshll.u32 %s1013_s13, 4  ;;  %s956_s24 = int_to_ptr.vmem [resolvable:$false] %s955_s24 }
  0x16   : > { %774 = vmatprep.subr.mxu1 %v1090_v2  ;;  %843 = vmatprep.subr.mxu0 %v1090_v2  ;;  %v1126_v7 = vld [vmem:[%s1499_s1 + $0x60] sm:$0xff]  ;;  %v1140_v9 = vld [vmem:[%s1499_s1 + $0x58] sm:$0xff]  ;;  %s141_s26 = scalar_lea.vmem %s1498_s0, %s770_s8  ;;  %v1157_v11 = vld [vmem:[%s1499_s1 + $0x50] sm:$0xff]  ;;  %s136_s8 = scalar_lea.vmem [#allocation2], %s696_s6 }
  0x17   : > { %775 = vmatpush3.msra.mxu1 %v1097_v3  ;;  %844 = vmatpush3.msra.mxu0 %v1097_v3  ;;  %v1164_v12 = vld [vmem:[%s1499_s1 + $0xc8] sm:$0xff]  ;;  %v1166_v13 = vld [vmem:[%s141_s26] sm:$0xff]  ;;  %v1199_v21 = vld [vmem:[%s1499_s1 + $0xb8] sm:$0xff]  ;;  %v1382_v52 = vsub.s32 0, %v433_v51  ;;  %s633_s14 = sshll.u32 %s136_s8, 4  ;;  %s957_s25 = scalar_lea.vmem %s956_s24, 512  ;;  %s634_s14 = int_to_ptr.vmem [resolvable:$true] %s633_s14 }
  0x18   : > { %776 = vmatprep.subr.mxu1 %v1104_v4  ;;  %845 = vmatprep.subr.mxu0 %v1104_v4  ;;  %v1173_v14 = vld [vmem:[%s1499_s1 + $0x48] sm:$0xff]  ;;  %v176_v16 = vrot.slane %v1166_v13, 4  ;;  %v1183_v17 = vld [vmem:[%s1499_s1 + $0xc0] sm:$0xff]  ;;  %v1207_v23 = vld [vmem:[%s1499_s1 + $0x38] sm:$0xff]  ;;  %s951_s23 = scalar_lea.vmem %s634_s14, 256  ;;  %p958_p0 = scmp.lt.s32.totalorder %s634_s14, %s956_s24 }
  0x19   : > { %777 = vmatpush3.msra.mxu1 %v1112_v5  ;;  %846 = vmatpush3.msra.mxu0 %v1112_v5  ;;  %v1175_v15 = vld [vmem:[%s141_s26 + $0x8] sm:$0xff]  ;;  %v1191_v19 = vld [vmem:[%s1499_s1 + $0x40] sm:$0xff]  ;;  %v1214_v24 = vld [vmem:[%s1499_s1 + $0xb0] sm:$0xff]  ;;  %p952_p11 = scmp.ne.s32.totalorder %s634_s14, %s951_s23  ;;  %p959_p1 = scmp.lt.s32.totalorder %s957_s25, %s951_s23 }
  0x1a   : > { %778 = vmatprep.subr.mxu1 %v1119_v6  ;;  %847 = vmatprep.subr.mxu0 %v1119_v6  ;;  %v182_v18 = vrot.slane %v1175_v15, 4  ;;  %v177_v20 = vadd.f32 %v176_v16, %v1166_v13  ;;  %v1221_v26 = vld [vmem:[%s1499_s1 + $0x30] sm:$0xff]  ;;  %v1228_v28 = vld [vmem:[%s1499_s1 + $0xa8] sm:$0xff]  ;;  %v1242_v31 = vld [vmem:[%s1499_s1 + $0xa0] sm:$0xff] }
  0x1b   : > { %779 = vmatpush3.msra.mxu1 %v1126_v7  ;;  %848 = vmatpush3.msra.mxu0 %v1126_v7  ;;  %v1235_v30 = vld [vmem:[%s1499_s1 + $0x28] sm:$0xff]  ;;  %v1249_v33 = vld [vmem:[%s1499_s1 + $0x20] sm:$0xff]  ;;  %v1256_v35 = vld [vmem:[%s1499_s1 + $0x98] sm:$0xff]  ;;  %p953_p12 = pnand %p952_p11, %p1067_p5  ;;  %p960_p2 = por %p959_p1, %p958_p0 }
  0x1c   : > { %780 = vmatprep.subr.mxu1 %v1133_v8  ;;  %849 = vmatprep.subr.mxu0 %v1133_v8  ;;  %v183_v22 = vadd.f32 %v182_v18, %v1175_v15  ;;  %v178_v27 = vrot.slane %v177_v20, 2  ;;  %v1263_v37 = vld [vmem:[%s1499_s1 + $0x18] sm:$0xff]  ;;  %v1270_v38 = vld [vmem:[%s1499_s1 + $0x90] sm:$0xff]  ;;  %v1283_v41 = vld [vmem:[%s1499_s1 + $0x88] sm:$0xff] }
  0x1d   : > { %781 = vmatpush3.msra.mxu1 %v1140_v9  ;;  %850 = vmatpush3.msra.mxu0 %v1140_v9  ;;  %v1276_v39 = vld [vmem:[%s1499_s1 + $0x10] sm:$0xff]  ;;  %v1290_v42 = vld [vmem:[%s1499_s1 + $0x8] sm:$0xff]  ;;  %v1297_v43 = vld [vmem:[%s1499_s1 + $0x80] sm:$0xff]  ;;  %p954_p13 = pneg %p953_p12 }
  0x1e   : > { %782 = vmatprep.subr.mxu1 %v1150_v10  ;;  %851 = vmatprep.subr.mxu0 %v1150_v10  ;;  %v184_v25 = vrot.slane %v183_v22, 2  ;;  %v179_v34 = vadd.f32 %v178_v27, %v177_v20  ;;  %v1304_v44 = vld [vmem:[%s1499_s1] sm:$0xff] }
  0x1f   : > { %783 = vmatpush3.msra.mxu1 %v1157_v11  ;;  %852 = vmatpush3.msra.mxu0 %v1157_v11  ;;  %p961_p3 = pnand %p960_p2, %p954_p13 }
  0x20   : > { %784 = vmatprep.subr.mxu1 %v1164_v12  ;;  %853 = vmatprep.subr.mxu0 %v1164_v12  ;;  %v185_v29 = vadd.f32 %v184_v25, %v183_v22  ;;  %v180_v40 = vrot.slane %v179_v34, 1 }
  0x21   : > { %785 = vmatpush3.msra.mxu1 %v1173_v14  ;;  %854 = vmatpush3.msra.mxu0 %v1173_v14 }
  0x22   : > { %786 = vmatprep.subr.mxu1 %v1183_v17  ;;  %855 = vmatprep.subr.mxu0 %v1183_v17  ;;  %v186_v32 = vrot.slane %v185_v29, 1  ;;  %v181_v45 = vadd.f32 %v180_v40, %v179_v34 }
  0x23   : > { %787 = vmatpush3.msra.mxu1 %v1191_v19  ;;  %856 = vmatpush3.msra.mxu0 %v1191_v19 }
  0x24   : > { %788 = vmatprep.subr.mxu1 %v1199_v21  ;;  %857 = vmatprep.subr.mxu0 %v1199_v21  ;;  %v187_v36 = vadd.f32 %v186_v32, %v185_v29 }
  0x25   : > { %789 = vmatpush3.msra.mxu1 %v1207_v23  ;;  %858 = vmatpush3.msra.mxu0 %v1207_v23 }
  0x26   : > { %790 = vmatprep.subr.mxu1 %v1214_v24  ;;  %859 = vmatprep.subr.mxu0 %v1214_v24 }
  0x27   : > { %791 = vmatpush3.msra.mxu1 %v1221_v26  ;;  %860 = vmatpush3.msra.mxu0 %v1221_v26 }
  0x28   : > { %792 = vmatprep.subr.mxu1 %v1228_v28  ;;  %861 = vmatprep.subr.mxu0 %v1228_v28 }
  0x29   : > { %793 = vmatpush3.msra.mxu1 %v1235_v30  ;;  %862 = vmatpush3.msra.mxu0 %v1235_v30 }
  0x2a   : > { %794 = vmatprep.subr.mxu1 %v1242_v31  ;;  %863 = vmatprep.subr.mxu0 %v1242_v31 }
  0x2b   : > { %795 = vmatpush3.msra.mxu1 %v1249_v33  ;;  %254 = vmatprep.mubr.f32.mxu1 %v187_v36 }
  0x2c   : > { %796 = vmatprep.subr.mxu1 %v1256_v35  ;;  %864 = vmatpush3.msra.mxu0 %v1249_v33 }
  0x2d   : > { %797 = vmatpush3.msra.mxu1 %v1263_v37  ;;  %865 = vmatprep.subr.mxu0 %v1256_v35 }
  0x2e   : > { %798 = vmatprep.subr.mxu1 %v1270_v38  ;;  %866 = vmatpush3.msra.mxu0 %v1263_v37 }
  0x2f   : > { %799 = vmatpush3.msra.mxu1 %v1276_v39  ;;  %867 = vmatprep.subr.mxu0 %v1270_v38 }
  0x30   : > { %800 = vmatprep.subr.mxu1 %v1283_v41  ;;  %868 = vmatpush3.msra.mxu0 %v1276_v39 }
  0x31   : > { %801 = vmatpush3.msra.mxu1 %v1290_v42  ;;  %869 = vmatprep.subr.mxu0 %v1283_v41 }
  0x32   : > { %802 = vmatprep.subr.mxu1 %v1297_v43  ;;  %870 = vmatpush3.msra.mxu0 %v1290_v42 }
  0x33   : > { %803 = vmatpush3.msra.mxu1 %v1304_v44  ;;  %871 = vmatprep.subr.mxu0 %v1297_v43 }
  0x34   : > { %255 = vmatmul.mubr.f32.vlgmr.msra.gmra.mxu1 %v181_v45  ;;  %807 = vmatprep.subr.msk.mxu1 %vm261_vm0, %v1080_v0 }
  0x35   : > { %808 = vmatpush3.xpose.msk.msra.mxu1 %vm261_vm0, %v1085_v1  ;;  %872 = vmatpush3.msra.mxu0 %v1304_v44 }
  0x36   : > { %809 = vmatprep.subr.msk.mxu1 %vm261_vm0, %v1090_v2  ;;  %876 = vmatprep.subr.msk.mxu0 %vm261_vm0, %v1080_v0 }
  0x39   : > { %810 = vmatpush3.xpose.msk.msra.mxu1 %vm261_vm0, %v1097_v3 }
  0x3a   : > { %811 = vmatprep.subr.msk.mxu1 %vm261_vm0, %v1104_v4 }
  0x3d   : > { %812 = vmatpush3.xpose.msk.msra.mxu1 %vm261_vm0, %v1112_v5 }
  0x3e   : > { %813 = vmatprep.subr.msk.mxu1 %vm261_vm0, %v1119_v6 }
  0x41   : > { %814 = vmatpush3.xpose.msk.msra.mxu1 %vm261_vm0, %v1126_v7 }
  0x42   : > { %815 = vmatprep.subr.msk.mxu1 %vm261_vm0, %v1133_v8 }
  0x45   : > { %816 = vmatpush3.xpose.msk.msra.mxu1 %vm261_vm0, %v1140_v9 }
  0x46   : > { %817 = vmatprep.subr.msk.mxu1 %vm261_vm0, %v1150_v10 }
  0x49   : > { %818 = vmatpush3.xpose.msk.msra.mxu1 %vm261_vm0, %v1157_v11 }
  0x4a   : > { %819 = vmatprep.subr.msk.mxu1 %vm261_vm0, %v1164_v12 }
  0x4d   : > { %820 = vmatpush3.xpose.msk.msra.mxu1 %vm261_vm0, %v1173_v14 }
  0x4e   : > { %821 = vmatprep.subr.msk.mxu1 %vm261_vm0, %v1183_v17 }
  0x51   : > { %822 = vmatpush3.xpose.msk.msra.mxu1 %vm261_vm0, %v1191_v19 }
  0x52   : > { %823 = vmatprep.subr.msk.mxu1 %vm261_vm0, %v1199_v21 }
  0x55   : > { %824 = vmatpush3.xpose.msk.msra.mxu1 %vm261_vm0, %v1207_v23 }
  0x56   : > { %825 = vmatprep.subr.msk.mxu1 %vm261_vm0, %v1214_v24 }
  0x59   : > { %826 = vmatpush3.xpose.msk.msra.mxu1 %vm261_vm0, %v1221_v26 }
  0x5a   : > { %827 = vmatprep.subr.msk.mxu1 %vm261_vm0, %v1228_v28 }
  0x5d   : > { %828 = vmatpush3.xpose.msk.msra.mxu1 %vm261_vm0, %v1235_v30 }
  0x5e   : > { %829 = vmatprep.subr.msk.mxu1 %vm261_vm0, %v1242_v31 }
  0x61   : > { %830 = vmatpush3.xpose.msk.msra.mxu1 %vm261_vm0, %v1249_v33 }
  0x62   : > { %831 = vmatprep.subr.msk.mxu1 %vm261_vm0, %v1256_v35 }
  0x65   : > { %832 = vmatpush3.xpose.msk.msra.mxu1 %vm261_vm0, %v1263_v37 }
  0x66   : > { %833 = vmatprep.subr.msk.mxu1 %vm261_vm0, %v1270_v38 }
  0x69   : > { %834 = vmatpush3.xpose.msk.msra.mxu1 %vm261_vm0, %v1276_v39 }
  0x6a   : > { %835 = vmatprep.subr.msk.mxu1 %vm261_vm0, %v1283_v41 }
  0x6d   : > { %836 = vmatpush3.xpose.msk.msra.mxu1 %vm261_vm0, %v1290_v42 }
  0x6e   : > { %837 = vmatprep.subr.msk.mxu1 %vm261_vm0, %v1297_v43 }
  0x71   : > { %838 = vmatpush3.xpose.msk.msra.mxu1 %vm261_vm0, %v1304_v44 }
  0xf4   : > { %v804_v46 = vpop.f32.mrf.mxu1 }
  0xf6   : > { %v805_v47 = vpop.f32.mrf.mxu1 }
  0xf7   : > { %v806_v48 = vadd.f32 %v805_v47, %v804_v46 }
  0xf9   : > { %v260_v49 = vmul.f32 0.0078125, %v806_v48 }
  0xfb   : > { %839 = vmatprep.mubr.msk.f32.mxu1 %vm261_vm0, %v260_v49 }
  0xfc   : > { %840 = vmatmul.mubr.msk.f32.vlgmr.msra.gmra.mxu1 %vm261_vm0, %v260_v49 }
 0x1bc   : > { %v427_v53 = vpop.f32.mrf.mxu1 }
 0x1bd   : > { %v435_v54 = vrot.slane %v427_v53, %v1382_v52 }
 0x1be   : > { %v429_v55 = vpop.f32.mrf.mxu1 }
 0x1bf   : > { %v1386_v56 = vsub.f32 %v1166_v13, %v435_v54  ;;  %v439_v57 = vrot.slane %v429_v55, %v1382_v52 }
 0x1c1   : > { %v442_v58 = vmul.f32 %v1386_v56, %v1386_v56  ;;  %v1392_v59 = vsub.f32 %v1175_v15, %v439_v57 }
 0x1c3   : > { %v444_v60 = vrot.slane %v442_v58, 4  ;;  %v443_v61 = vmul.f32 %v1392_v59, %v1392_v59 }
 0x1c5   : > { %v445_v62 = vadd.f32 %v444_v60, %v442_v58  ;;  %v450_v63 = vrot.slane %v443_v61, 4 }
 0x1c7   : > { %v451_v0 = vadd.f32 %v450_v63, %v443_v61  ;;  %v446_v16 = vrot.slane %v445_v62, 2 }
 0x1c9   : > { %v452_v18 = vrot.slane %v451_v0, 2  ;;  %v447_v20 = vadd.f32 %v446_v16, %v445_v62 }
 0x1cb   : > { %v453_v13 = vadd.f32 %v452_v18, %v451_v0  ;;  %v448_v22 = vrot.slane %v447_v20, 1 }
 0x1cd   : > { %v454_v25 = vrot.slane %v453_v13, 1  ;;  %v449_v29 = vadd.f32 %v448_v22, %v447_v20 }
 0x1cf   : > { %v455_v27 = vadd.f32 %v454_v25, %v453_v13 }
 0x1d1   : > { %522 = vmatprep.mubr.f32.mxu0 %v455_v27 }
 0x1d2   : > { %523 = vmatmul.mubr.f32.vlgmr.msra.gmra.mxu0 %v449_v29 }
 0x1d3   : > { %877 = vmatpush3.xpose.msk.msra.mxu0 %vm261_vm0, %v1085_v1 }
 0x1d4   : > { %878 = vmatprep.subr.msk.mxu0 %vm261_vm0, %v1090_v2 }
 0x1d7   : > { %879 = vmatpush3.xpose.msk.msra.mxu0 %vm261_vm0, %v1097_v3 }
 0x1d8   : > { %880 = vmatprep.subr.msk.mxu0 %vm261_vm0, %v1104_v4 }
 0x1db   : > { %881 = vmatpush3.xpose.msk.msra.mxu0 %vm261_vm0, %v1112_v5 }
 0x1dc   : > { %882 = vmatprep.subr.msk.mxu0 %vm261_vm0, %v1119_v6 }
 0x1df   : > { %883 = vmatpush3.xpose.msk.msra.mxu0 %vm261_vm0, %v1126_v7 }
 0x1e0   : > { %884 = vmatprep.subr.msk.mxu0 %vm261_vm0, %v1133_v8 }
 0x1e3   : > { %885 = vmatpush3.xpose.msk.msra.mxu0 %vm261_vm0, %v1140_v9 }
 0x1e4   : > { %886 = vmatprep.subr.msk.mxu0 %vm261_vm0, %v1150_v10 }
 0x1e7   : > { %887 = vmatpush3.xpose.msk.msra.mxu0 %vm261_vm0, %v1157_v11 }
 0x1e8   : > { %888 = vmatprep.subr.msk.mxu0 %vm261_vm0, %v1164_v12 }
 0x1eb   : > { %889 = vmatpush3.xpose.msk.msra.mxu0 %vm261_vm0, %v1173_v14 }
 0x1ec   : > { %890 = vmatprep.subr.msk.mxu0 %vm261_vm0, %v1183_v17 }
 0x1ef   : > { %891 = vmatpush3.xpose.msk.msra.mxu0 %vm261_vm0, %v1191_v19 }
 0x1f0   : > { %892 = vmatprep.subr.msk.mxu0 %vm261_vm0, %v1199_v21 }
 0x1f3   : > { %893 = vmatpush3.xpose.msk.msra.mxu0 %vm261_vm0, %v1207_v23 }
 0x1f4   : > { %894 = vmatprep.subr.msk.mxu0 %vm261_vm0, %v1214_v24 }
 0x1f7   : > { %895 = vmatpush3.xpose.msk.msra.mxu0 %vm261_vm0, %v1221_v26 }
 0x1f8   : > { %896 = vmatprep.subr.msk.mxu0 %vm261_vm0, %v1228_v28 }
 0x1fb   : > { %897 = vmatpush3.xpose.msk.msra.mxu0 %vm261_vm0, %v1235_v30 }
 0x1fc   : > { %898 = vmatprep.subr.msk.mxu0 %vm261_vm0, %v1242_v31 }
 0x1ff   : > { %899 = vmatpush3.xpose.msk.msra.mxu0 %vm261_vm0, %v1249_v33 }
 0x200   : > { %900 = vmatprep.subr.msk.mxu0 %vm261_vm0, %v1256_v35 }
 0x203   : > { %901 = vmatpush3.xpose.msk.msra.mxu0 %vm261_vm0, %v1263_v37 }
 0x204   : > { %902 = vmatprep.subr.msk.mxu0 %vm261_vm0, %v1270_v38 }
 0x207   : > { %903 = vmatpush3.xpose.msk.msra.mxu0 %vm261_vm0, %v1276_v39 }
 0x208   : > { %904 = vmatprep.subr.msk.mxu0 %vm261_vm0, %v1283_v41 }
 0x20b   : > { %905 = vmatpush3.xpose.msk.msra.mxu0 %vm261_vm0, %v1290_v42 }
 0x20c   : > { %906 = vmatprep.subr.msk.mxu0 %vm261_vm0, %v1297_v43 }
 0x20f   : > { %907 = vmatpush3.xpose.msk.msra.mxu0 %vm261_vm0, %v1304_v44 }
 0x292   : > { %v873_v1 = vpop.f32.mrf.mxu0 }
 0x294   : > { %v874_v2 = vpop.f32.mrf.mxu0 }
 0x295   : > { %v875_v3 = vadd.f32 %v874_v2, %v873_v1 }
 0x297   : > { %v528_v4 = vmul.f32 0.0078125, %v875_v3 }
 0x299   : > { %v529_v5 = vmax.f32 %v528_v4, 0.0 }
 0x29b   : > { %v530_v6 = vadd.f32 1e-05, %v529_v5 }
 0x29d   : > { %949 = vrsqrt.f32 %v530_v6 }
 0x2aa   : > { %v950_v7 = vpop.eup %949 }
 0x2ab   : > { %908 = vmatprep.mubr.msk.f32.mxu0 %vm261_vm0, %v950_v7 }
 0x2ac   : > { %909 = vmatmul.mubr.msk.f32.vlgmr.msra.gmra.mxu0 %vm261_vm0, %v950_v7 }
 0x36c   : > { %v601_v8 = vpop.f32.mrf.mxu0 }
 0x36d   : > { %v609_v9 = vrot.slane %v601_v8, %v1382_v52 }
 0x36e   : > { %v603_v10 = vpop.f32.mrf.mxu0 }
 0x36f   : > { %v614_v11 = vmul.f32 %v609_v9, %v1386_v56  ;;  %v613_v12 = vrot.slane %v603_v10, %v1382_v52 }
 0x371   : > { %616 = vst [vmem:[%s136_s8] sm:$0xff] %v614_v11  ;;  %v615_v14 = vmul.f32 %v613_v12, %v1392_v59 }
 0x373   : > { %617 = vst [vmem:[%s136_s8 + $0x8] sm:$0xff] %v615_v14 }
 0x374   : > { %964 = shalt.err (!%p961_p3)
}
 0x375   : > { %s965_s26 = scalar_lea.hbm %s631_s21, 256  ;;  %s969_s29 = scalar_lea.hbm %s1500_s2, 512 }
 0x376   : > { %p966_p4 = scmp.ne.s32.totalorder %s631_s21, %s965_s26  ;;  %p970_p9 = scmp.lt.s32.totalorder %s631_s21, %s1500_s2 }
 0x377   : > { %p971_p10 = scmp.lt.s32.totalorder %s969_s29, %s965_s26 }
 0x378   : > { %p967_p7 = pnand %p966_p4, %p1067_p5 }
 0x379   : > { %p972_p11 = por %p971_p10, %p970_p9 }
 0x37a   : > { %p968_p8 = pneg %p967_p7 }
 0x37c   : > { %p973_p12 = pnand %p972_p11, %p968_p8 }
 0x37e   : > { %976 = shalt.err (!%p973_p12)
}
 0x37f   : > { %910 = dma.vmem_to_hbm [thread:$0]  (%p1067_p5), %s634_s14, 256, %s631_s21, %s619_s22  }
 0x380 PF: > { %p916_p13 = scmp.ge.s32.totalorder %s1011_s12, 2  ;;  %s645_s4 = sand.u32 1, %s999_s9  }
 0x381   : > { %s646_s5 = scalar_lea.sflag [#allocation3], %s645_s4 }
 0x382   : > { %p913_p0 = pnand %p916_p13, %p1071_p6 }
 0x384   : > { %p914_p1 = pneg %p913_p0 }
 0x386   : > { %994 = dma.done.wait (%p914_p1), %s646_s5, 256  }
 0x387   : > { %996 = vsyncadd (%p914_p1), %s646_s5, 4294967040  ;;  %p12_p2 = scmp.ge.s32.totalorder %s1054_s15, 4   ;;  %s1503_s9 = smov %s1003_s10 }
 0x388   : > { %s1504_s10 = smov %s1007_s11  ;;  %s1505_s11 = smov %s1065_s18 }
 0x389   : > { %s1506_s12 = smov %s1054_s15  ;;  %14 = sbr.rel (!%p12_p2) target bundleno = 3 (0x3), region = 63 }
 0x38e   :  { %651 = vsyncpa [#allocation3], 1 }
 0x38f   :  { %653 = vsyncpa [#allocation3 + $0x1], 1 }

</bundles_post_ra>
